<compile_context>
chip_gen: v5e
topology: v5e:2x2
jax: 0.10.0
libtpu: 0.0.40
codegen_flags: <defaults>
</compile_context>

<pallas_src>
import jax
import jax.numpy as jnp
from jax.experimental import pallas as pl
from jax.experimental.pallas import tpu as pltpu

_LANE = 128


def _round_up(x: int, m: int) -> int:
    return -(-x // m) * m


def _sublane_granule(dtype) -> int:
    # (8,128) tiles for 4-byte dtypes, (16,128) for 2-byte, (32,128) for 1-byte.
    return 8 * max(1, 4 // jnp.dtype(dtype).itemsize)


def _num_tensorcores() -> int:
    """Best-effort: how many TensorCores one 'parallel' grid axis can span."""
    try:
        kind = jax.devices()[0].device_kind.lower()
    except Exception:
        return 1
    # Single-TensorCore generations: v5e ("v5 lite"), v6e ("v6 lite"/"trillium").
    if "lite" in kind or "v5e" in kind or "v6e" in kind or "trillium" in kind:
        return 1
    return 2  # v4/v5p megacore and v7x expose 2 TCs to a 'parallel' grid axis.


# ----------------------------------------------------------------------------
# Kernels
# ----------------------------------------------------------------------------
def _node2body_dense_kernel(x_ref, o_ref):
    # x_ref: (rb, T, wb) in VMEM; only column 0 of the last axis is used.
    # o_ref: (rb, T*5)   lane-dense output block.
    rb, T, _ = x_ref.shape
    col0 = x_ref[:, :, 0:1]                          # (rb, T, 1)
    y = jnp.broadcast_to(col0, (rb, T, 5))           # (rb, T, 5)
    o_ref[...] = y.reshape(rb, T * 5)                # lane interleave -> dense store


def _node2body_sparse_kernel(x_ref, o_ref):
    # Fallback (known-good): x_ref (rb, T, wb) -> o_ref (rb, T, 5).
    col0 = x_ref[:, :, 0:1]                          # (rb, T, 1)
    o_ref[...] = jnp.broadcast_to(col0, o_ref.shape)


# ----------------------------------------------------------------------------
# Tiling plan
# ----------------------------------------------------------------------------
def _plan(M, T, wb, dtype, lane_dense, ntc, budget):
    item = jnp.dtype(dtype).itemsize
    gran = _sublane_granule(dtype)

    # Per-row (per m), per-buffer VMEM cost of the padded tiles.
    in_row = _round_up(T, gran) * _round_up(wb, _LANE) * item
    if lane_dense:
        out_row = _round_up(T * 5, _LANE) * item         # per sublane row (2-D tile)
        slack = 2 * gran * out_row                       # sublane padding of out tile
    else:
        out_row = _round_up(T, gran) * _LANE * item      # 3-D tile, 5 -> 128 lane pad
        slack = 0
    per_row = 2 * in_row + 2 * out_row                   # double-buffered in + out

    rb = max(1, (budget - slack) // per_row)
    rb = min(rb, M)

    def legal(r):
        if r == M:
            return True
        if lane_dense:
            # 2-D out block: second-minor dim must be a multiple of the granule.
            return r % gran == 0
        return True  # 3-D out block: rb is a leading dim, unconstrained.

    if not legal(rb):
        rb = max(gran, (rb // gran) * gran)
        if rb > M:
            rb = M
    grid_m = -(-M // rb)

    # Dual-TC chips only: shrink the tile iff it yields an exactly even split.
    if ntc > 1 and M > 1:
        gm_even = _round_up(max(grid_m, ntc), ntc)
        rb_e = -(-M // gm_even)
        if lane_dense and rb_e != M and rb_e % gran:
            rb_e = _round_up(rb_e, gran)
        if rb_e <= rb and legal(rb_e) and -(-M // rb_e) == gm_even:
            rb, grid_m = rb_e, gm_even

    if lane_dense:
        usage = 2 * rb * in_row + 2 * _round_up(rb, gran) * out_row
    else:
        usage = 2 * rb * in_row + 2 * rb * out_row
    vmem_limit = min(max(int(usage * 5 // 4), 4 * 1024 * 1024), 48 * 1024 * 1024)
    return rb, grid_m, vmem_limit


def _pallas_node2body(x2, T, wb, *, lane_dense, rb, grid_m, vmem_limit):
    M = x2.shape[0]
    dtype = x2.dtype
    in_spec = pl.BlockSpec((rb, T, wb), lambda i: (i, 0, 0))
    if lane_dense:
        kernel = _node2body_dense_kernel
        out_shape = jax.ShapeDtypeStruct((M, T * 5), dtype)
        out_spec = pl.BlockSpec((rb, T * 5), lambda i: (i, 0))
    else:
        kernel = _node2body_sparse_kernel
        out_shape = jax.ShapeDtypeStruct((M, T, 5), dtype)
        out_spec = pl.BlockSpec((rb, T, 5), lambda i: (i, 0, 0))
    return pl.pallas_call(
        kernel,
        out_shape=out_shape,
        grid=(grid_m,),
        in_specs=[in_spec],
        out_specs=out_spec,
        compiler_params=pltpu.CompilerParams(
            dimension_semantics=("parallel",),
            vmem_limit_bytes=vmem_limit,
        ),
    )(x2)


# ----------------------------------------------------------------------------
# Public wrapper
# ----------------------------------------------------------------------------
def up_node2body(node: jax.Array,
                 *,
                 vmem_budget_bytes: int = 16 * 1024 * 1024) -> jax.Array:
    """Pallas implementation of up_Node2Body.forward."""
    N, d, T, w = node.shape
    M = N * d
    dtype = node.dtype

    # Clamp the budget so the (usage * 1.25) limit we request always covers it.
    budget = int(min(max(vmem_budget_bytes, 1 << 20), 28 << 20))
    ntc = _num_tensorcores()

    # Only column 0 is needed: narrowest legal last-dim block.
    wb = w if w < _LANE else _LANE

    # Flatten (N, d) into one row axis; free for the default contiguous layout.
    x2 = node.reshape(M, T, w)

    # Fast path: lane-dense (M, T*5) output.  The in-kernel (rb,T,5)->(rb,T*5)
    # relayout may not be supported by every Mosaic toolchain, so fall back to
    # the lane-sparse (but always-lowering) kernel on any compile failure.
    # (Fallback detection only works when called eagerly, as in this script.)
    try:
        rb, gm, lim = _plan(M, T, wb, dtype, True, ntc, budget)
        out = _pallas_node2body(x2, T, wb, lane_dense=True,
                                rb=rb, grid_m=gm, vmem_limit=lim)
        out = jax.block_until_ready(out)
        return out.reshape(N, d, T, 5)          # free: same HBM bytes/order
    except Exception:
        pass

    rb, gm, lim = _plan(M, T, wb, dtype, False, ntc, budget)
    out = _pallas_node2body(x2, T, wb, lane_dense=False,
                            rb=rb, grid_m=gm, vmem_limit=lim)
    return out.reshape(N, d, T, 5)


if __name__ == "__main__":
    key = jax.random.PRNGKey(0)
    N, d, T, w = 2, 4, 16, 16          # small shapes consistent with (N, d, T, w)
    node = jax.random.normal(key, (N, d, T, w), dtype=jnp.float32)

    out = jax.block_until_ready(up_node2body(node))

    # Reference (plain JAX) for correctness.
    ref = jnp.broadcast_to(node[..., 0:1], (N, d, T, 5))
    assert out.shape == (N, d, T, 5), out.shape
    assert out.dtype == node.dtype, out.dtype
    assert jnp.array_equal(out, ref), "mismatch vs reference"

    print("KERNEL_OK")
</pallas_src>

<mosaic_0001>
module attributes {stable_mosaic.version = 11 : i64} {
  func.func @_node2body_dense_kernel(%arg0: i32, %arg1: memref<8x16x16xf32, #tpu.memory_space<vmem>>, %arg2: memref<8x80xf32, #tpu.memory_space<vmem>>) attributes {dimension_semantics = [#tpu.dimension_semantics<parallel>], iteration_bounds = array<i64: 1>, scalar_prefetch = 0 : i64, scratch_operands = 0 : i64, tpu.core_type = #tpu.core_type<tc>, window_params = [{transform_indices = @transform_0, window_bounds = array<i64: 8, 16, 16>}, {transform_indices = @transform_1, window_bounds = array<i64: 8, 80>}]} {
    %c0 = arith.constant 0 : index
    %c0_0 = arith.constant 0 : index
    %c0_1 = arith.constant 0 : index
    %0 = vector.load %arg1[%c0, %c0_0, %c0_1] : memref<8x16x16xf32, #tpu.memory_space<vmem>>, vector<8x16x1xf32>
    %1 = vector.shape_cast %0 : vector<8x16x1xf32> to vector<8x16x1xf32>
    %2 = vector.broadcast %1 : vector<8x16x1xf32> to vector<8x16x5xf32>
    %3 = vector.shape_cast %2 : vector<8x16x5xf32> to vector<8x80xf32>
    %c0_2 = arith.constant 0 : index
    %c0_3 = arith.constant 0 : index
    %4 = vector.load %arg2[%c0_2, %c0_3] : memref<8x80xf32, #tpu.memory_space<vmem>>, vector<8x80xf32>
    tpu.vector_store %arg2[%c0_2, %c0_3], %3 {strides = array<i32>} : memref<8x80xf32, #tpu.memory_space<vmem>>, vector<8x80xf32>,
    return
  }
  func.func @transform_0(%arg0: i32) -> (i32, i32, i32) {
    %c0_i32 = arith.constant 0 : i32
    %c0_i32_0 = arith.constant 0 : i32
    %c0_i32_1 = arith.constant 0 : i32
    return %arg0, %c0_i32, %c0_i32_0 : i32, i32, i32
  }
  func.func @transform_1(%arg0: i32) -> (i32, i32) {
    %c0_i32 = arith.constant 0 : i32
    %c0_i32_0 = arith.constant 0 : i32
    return %arg0, %c0_i32 : i32, i32
  }
}

module attributes {stable_mosaic.version = 11 : i64} {
  func.func @_node2body_sparse_kernel(%arg0: i32, %arg1: memref<4x16x16xf32, #tpu.memory_space<vmem>>, %arg2: memref<4x16x5xf32, #tpu.memory_space<vmem>>) attributes {dimension_semantics = [#tpu.dimension_semantics<parallel>], iteration_bounds = array<i64: 2>, scalar_prefetch = 0 : i64, scratch_operands = 0 : i64, tpu.core_type = #tpu.core_type<tc>, window_params = [{transform_indices = @transform_0, window_bounds = array<i64: 4, 16, 16>}, {transform_indices = @transform_1, window_bounds = array<i64: 4, 16, 5>}]} {
    %c0 = arith.constant 0 : index
    %c0_0 = arith.constant 0 : index
    %c0_1 = arith.constant 0 : index
    %0 = vector.load %arg1[%c0, %c0_0, %c0_1] : memref<4x16x16xf32, #tpu.memory_space<vmem>>, vector<4x16x1xf32>
    %1 = vector.shape_cast %0 : vector<4x16x1xf32> to vector<4x16x1xf32>
    %2 = vector.broadcast %1 : vector<4x16x1xf32> to vector<4x16x5xf32>
    %c0_2 = arith.constant 0 : index
    %c0_3 = arith.constant 0 : index
    %c0_4 = arith.constant 0 : index
    %3 = vector.load %arg2[%c0_2, %c0_3, %c0_4] : memref<4x16x5xf32, #tpu.memory_space<vmem>>, vector<4x16x5xf32>
    tpu.vector_store %arg2[%c0_2, %c0_3, %c0_4], %2 {strides = array<i32>} : memref<4x16x5xf32, #tpu.memory_space<vmem>>, vector<4x16x5xf32>,
    return
  }
  func.func @transform_0(%arg0: i32) -> (i32, i32, i32) {
    %c0_i32 = arith.constant 0 : i32
    %c0_i32_0 = arith.constant 0 : i32
    %c0_i32_1 = arith.constant 0 : i32
    return %arg0, %c0_i32, %c0_i32_0 : i32, i32, i32
  }
  func.func @transform_1(%arg0: i32) -> (i32, i32, i32) {
    %c0_i32 = arith.constant 0 : i32
    %c0_i32_0 = arith.constant 0 : i32
    %c0_i32_1 = arith.constant 0 : i32
    return %arg0, %c0_i32, %c0_i32_0 : i32, i32, i32
  }
}

</mosaic_0001>

<bundles_post_ra>
// kernel: tpu_custom_call.1
= control target key start
LH: loop header
LB: loop body
LE: loop exit
PB: predicated region body
PF: predicated region fallthrough
CT: control target
= control target key end

     0   :  { %6 = vsyncpa [#allocation3], 0  ;;  %s669_s0 = inlined_call_operand.hbm [shape: f32[8,16,16], index: 0, kind: input, shape index: {}]   ;;  %s670_s1 = inlined_call_operand.hbm [shape: f32[8,80], index: 1, kind: output, shape index: {}]  }
   0x1   :  { %7 = vsyncpa [#allocation4], 0  ;;  %s12_s8 = sshll.u32 %s669_s0, 4  ;;  %s532_s9 = smov [#allocation2]   ;;  %s13_s8 = int_to_ptr.hbm [resolvable:$true] %s12_s8 }
   0x2   :  { %s14_s10 = sshll.u32 %s532_s9, 4  ;;  %s533_s11 = smov 128   ;;  %s15_s10 = int_to_ptr.vmem [resolvable:$true] %s14_s10 }
   0x3   :  { %s534_s12 = smov 8  }
   0x4   :  { %20 = dma.hbm_to_vmem [thread:$0]  %s13_s8, 2048, %s15_s10, [#allocation3], %s533_s11, %s533_s11, %s534_s12  }
   0x5   :  { %528 = dma.done.wait [#allocation3], 2048  }
   0x6   :  { %529 = vsyncadd [#allocation3], 4294965248  ;;  %v535_v0 = vmov 0   ;;  %v29_v1 = vld [vmem:[#allocation2 + $0x20] sm:$0xff]  ;;  %v27_v2 = vld [vmem:[#allocation2 + $0x10] sm:$0xff]  ;;  %vm122_vm0 = vcmask 1047556  }
   0x7   :  { %479 = vset.pattern.permute.xlu2 %v535_v0  ;;  %478 = vset.pattern.permute.xlu1 %v535_v0  ;;  %v25_v3 = vld [vmem:[#allocation2] sm:$0xff]  ;;  %v30_v4 = vld [vmem:[#allocation2 + $0x28] sm:$0xff]  ;;  %v28_v5 = vld [vmem:[#allocation2 + $0x18] sm:$0xff]  ;;  %v536_v23 = vmov 1983009808   ;;  %s538_s0 = smov 5  }
   0x8   :  { %477 = vset.pattern.permute.xlu0 %v535_v0  ;;  %63 = vperm.xlu2 %479, %v29_v1   ;;  %v26_v6 = vld [vmem:[#allocation2 + $0x8] sm:$0xff]  ;;  %v39_v7 = vld [vmem:[#allocation2 + $0x70] sm:$0xff]  ;;  %v37_v8 = vld [vmem:[#allocation2 + $0x60] sm:$0xff]  ;;  %v127_v24 = vunpack.c.l.s4 %v536_v23  ;;  %v537_v34 = vmov 1934713408   ;;  %s539_s13 = smov 15  }
   0x9   :  { %53 = vperm.xlu1 %478, %v27_v2   ;;  %43 = vperm.xlu0 %477, %v25_v3   ;;  %v31_v9 = vld [vmem:[#allocation2 + $0x30] sm:$0xff]  ;;  %v40_v10 = vld [vmem:[#allocation2 + $0x78] sm:$0xff]  ;;  %v33_v12 = vld [vmem:[#allocation2 + $0x40] sm:$0xff]  ;;  %v175_v35 = vunpack.c.l.s4 %v537_v34  ;;  %s540_s14 = smov 10   ;;  %s541_s15 = smov 30   ;;  %vm406_vm1 = vcmask 39936  }
   0xa   :  { %v35_v11 = vld [vmem:[#allocation2 + $0x50] sm:$0xff]  ;;  %v38_v13 = vld [vmem:[#allocation2 + $0x68] sm:$0xff]  ;;  %v36_v14 = vld [vmem:[#allocation2 + $0x58] sm:$0xff]  ;;  %v573_v26 = vunpack.c.0.s8 %v127_v24  ;;  %s542_s16 = smov 20   ;;  %s543_s17 = smov 25   ;;  %vm408_vm2 = vcmask 80896  }
   0xb   :  { %v32_v15 = vld [vmem:[#allocation2 + $0x38] sm:$0xff]  ;;  %v34_v16 = vld [vmem:[#allocation2 + $0x48] sm:$0xff]  ;;  %v580_v45 = vunpack.c.0.s8 %v175_v35  ;;  %s544_s18 = smov 35   ;;  %s545_s19 = smov 45   ;;  %vm410_vm3 = vcmask 121856   ;;  %vm412_vm4 = vcmask 162816  }
   0xc   :  { %s546_s20 = smov 40   ;;  %s547_s21 = smov 50   ;;  %vm414_vm5 = vcmask 203776   ;;  %vm416_vm6 = vcmask 244736   ;;  %vm418_vm7 = vcmask 285696   ;;  %vm420_vm8 = vcmask 326656  }
   0xd   :  { %s548_s22 = smov 60   ;;  %s549_s23 = smov 55   ;;  %vm422_vm9 = vcmask 367616   ;;  %vm424_vm10 = vcmask 408576   ;;  %vm426_vm11 = vcmask 449536   ;;  %vm428_vm12 = vcmask 490496  }
   0xe   :  { %s550_s24 = smov 65   ;;  %s551_s25 = smov 75   ;;  %vm430_vm13 = vcmask 531456   ;;  %vm432_vm14 = vcmask 572416   ;;  %vm434_vm15 = vcmask 613376  }
   0xf   :  { %s552_s26 = smov 70   ;;  %s553_s27 = smov [#allocation5]  }
  0x10   :  { %68 = vperm.xlu2 %479, %v30_v4   ;;  %s443_s28 = sshll.u32 %s553_s27, 4  ;;  %s445_s2 = sshll.u32 %s670_s1, 4  ;;  %s444_s28 = int_to_ptr.vmem [resolvable:$true] %s443_s28  ;;  %s446_s2 = int_to_ptr.hbm [resolvable:$true] %s445_s2 }
  0x11   :  { %58 = vperm.xlu1 %478, %v28_v5   ;;  %48 = vperm.xlu0 %477, %v26_v6  }
  0x18   :  { %113 = vperm.xlu2 %479, %v39_v7  }
  0x19   :  { %103 = vperm.xlu1 %478, %v37_v8   ;;  %73 = vperm.xlu0 %477, %v31_v9  }
  0x20   :  { %118 = vperm.xlu2 %479, %v40_v10  }
  0x21   :  { %93 = vperm.xlu1 %478, %v35_v11   ;;  %83 = vperm.xlu0 %477, %v33_v12  }
  0x28   :  { %108 = vperm.xlu2 %479, %v38_v13  }
  0x29   :  { %98 = vperm.xlu1 %478, %v36_v14   ;;  %78 = vperm.xlu0 %477, %v32_v15  }
  0x31   :  { %88 = vperm.xlu0 %477, %v34_v16  }
  0x62   :  { %v64_v17 = vpop.permute.xlu2 %63 }
  0x63   :  { %v121_v25 = vrot.slane %v64_v17, 4 }
  0x6a   :  { %v567_v20 = vpop.permute.xlu2 %68 }
  0x6b   :  { %v234_v3 = vrot.slane %v567_v20, 4 }
  0x72   :  { %v114_v29 = vpop.permute.xlu2 %113 }
  0x73   :  { %v158_v39 = vrot.slane %v114_v29, 4 }
  0x7a   :  { %v119_v55 = vpop.permute.xlu2 %118 }
  0x7b   :  { %v54_v18 = vpop.permute.xlu1 %53  ;;  %v44_v19 = vpop.permute.xlu0 %43 }
  0x7c   :  { %v123_v27 = vsel %vm122_vm0, %v121_v25, %v44_v19  ;;  %v136_v37 = vrot.slane %v54_v18, 4  ;;  %v124_v38 = vrot.slane %v44_v19, 4 }
  0x7d   :  { %v129_v32 = vperm.slane %v123_v27, %v573_v26 }
  0x7e   :  { %v125_v51 = vsel %vm122_vm0, %v64_v17, %v124_v38 }
  0x7f   :  { %v172_v40 = vrot.slane %v129_v32, 4  ;;  %v133_v0 = vperm.slane %v125_v51, %v573_v26 }
  0x81   :  { %v184_v14 = vrot.slane %v133_v0, 4 }
  0x82   :  { %v109_v34 = vpop.permute.xlu2 %108 }
  0x83   :  { %v569_v21 = vpop.permute.xlu1 %58  ;;  %v571_v22 = vpop.permute.xlu0 %48 }
  0x84   :  { %v235_v19 = vsel %vm122_vm0, %v234_v3, %v571_v22 }
  0x8b   :  { %v104_v28 = vpop.permute.xlu1 %103  ;;  %v74_v30 = vpop.permute.xlu0 %73 }
  0x8c   :  { %v134_v31 = vrot.slane %v74_v30, 4  ;;  %v146_v42 = vrot.slane %v104_v28, 4  ;;  %v137_v43 = vsel %vm122_vm0, %v74_v30, %v136_v37 }
  0x8d   :  { %v145_v56 = vperm.slane %v137_v43, %v573_v26 }
  0x8e   :  { %v135_v33 = vsel %vm122_vm0, %v134_v31, %v54_v18  ;;  %v270_v18 = vrot.slane %v119_v55, 4 }
  0x8f   :  { %v141_v36 = vperm.slane %v135_v33, %v573_v26  ;;  %v182_v10 = vrot.slane %v145_v56, 4  ;;  %v185_v27 = vsel %vm122_vm0, %v145_v56, %v184_v14 }
  0x91   :  { %v170_v41 = vrot.slane %v141_v36, 4  ;;  %v173_v49 = vsel %vm122_vm0, %v141_v36, %v172_v40  ;;  %v183_v33 = vsel %vm122_vm0, %v182_v10, %v133_v0 }
  0x92   :  { %v181_v63 = vperm.slane %v173_v49, %v580_v45  ;;  %v193_v49 = vperm.slane %v185_v27, %v580_v45 }
  0x93   :  { %v94_v44 = vpop.permute.xlu1 %93  ;;  %v84_v48 = vpop.permute.xlu0 %83  ;;  %v171_v50 = vsel %vm122_vm0, %v170_v41, %v129_v32 }
  0x94   :  { %v159_v46 = vsel %vm122_vm0, %v158_v39, %v94_v44  ;;  %v160_v47 = vrot.slane %v94_v44, 4  ;;  %v147_v53 = vsel %vm122_vm0, %v146_v42, %v84_v48  ;;  %v148_v54 = vrot.slane %v84_v48, 4 }
  0x95   :  { %v165_v52 = vperm.slane %v159_v46, %v573_v26  ;;  %v153_v58 = vperm.slane %v147_v53, %v573_v26  ;;  %v177_v59 = vperm.slane %v171_v50, %v580_v45  ;;  %v224_v13 = vrot.slane %v181_v63, 4 }
  0x96   :  { %v161_v57 = vsel %vm122_vm0, %v114_v29, %v160_v47  ;;  %v149_v62 = vsel %vm122_vm0, %v104_v28, %v148_v54  ;;  %v248_v39 = vrot.slane %v569_v21, 4  ;;  %v241_v42 = vperm.slane %v235_v19, %v573_v26 }
  0x97   :  { %v169_v60 = vperm.slane %v161_v57, %v573_v26  ;;  %v194_v61 = vrot.slane %v165_v52, 4  ;;  %v157_v1 = vperm.slane %v149_v62, %v573_v26  ;;  %v196_v2 = vrot.slane %v153_v58, 4 }
  0x98   :  { %v220_v5 = vrot.slane %v177_v59, 4  ;;  %v189_v46 = vperm.slane %v183_v33, %v580_v45  ;;  %v258_v47 = vrot.slane %v109_v34, 4 }
  0x99   :  { %v195_v4 = vsel %vm122_vm0, %v194_v61, %v153_v58  ;;  %v206_v6 = vrot.slane %v169_v60, 4  ;;  %v208_v7 = vrot.slane %v157_v1, 4  ;;  %v197_v8 = vsel %vm122_vm0, %v165_v52, %v196_v2 }
  0x9a   :  { %v201_v9 = vperm.slane %v195_v4, %v580_v45  ;;  %v205_v12 = vperm.slane %v197_v8, %v580_v45  ;;  %v236_v58 = vrot.slane %v571_v22, 4  ;;  %v228_v62 = vrot.slane %v189_v46, 4 }
  0x9b   :  { %v99_v11 = vpop.permute.xlu1 %98  ;;  %v79_v16 = vpop.permute.xlu0 %78  ;;  %v209_v28 = vsel %vm122_vm0, %v169_v60, %v208_v7  ;;  %v207_v29 = vsel %vm122_vm0, %v206_v6, %v157_v1 }
  0x9c   :  { %v272_v15 = vrot.slane %v99_v11, 4  ;;  %v221_v17 = vsel %vm122_vm0, %v201_v9, %v220_v5  ;;  %v246_v23 = vrot.slane %v79_v16, 4  ;;  %v225_v24 = vsel %vm122_vm0, %v205_v12, %v224_v13 }
  0x9d   :  { %347 = vrot.lane.b32.xlu1 %v221_v17, %s538_s0  ;;  %355 = vrot.lane.b32.xlu0 %v225_v24, %s539_s13  ;;  %v222_v25 = vrot.slane %v205_v12, 4  ;;  %v271_v30 = vsel %vm122_vm0, %v270_v18, %v99_v11  ;;  %v217_v32 = vperm.slane %v209_v28, %v580_v45  ;;  %v218_v37 = vrot.slane %v201_v9, 4 }
  0x9e   :  { %v247_v31 = vsel %vm122_vm0, %v246_v23, %v569_v21  ;;  %v273_v35 = vsel %vm122_vm0, %v119_v55, %v272_v15  ;;  %v213_v41 = vperm.slane %v207_v29, %v580_v45  ;;  %v277_v43 = vperm.slane %v271_v30, %v573_v26 }
  0x9f   :  { %v253_v36 = vperm.slane %v247_v31, %v573_v26  ;;  %v223_v38 = vsel %vm122_vm0, %v222_v25, %v181_v63  ;;  %v230_v40 = vrot.slane %v217_v32, 4  ;;  %v281_v48 = vperm.slane %v273_v35, %v573_v26 }
  0xa0   :  { %351 = vrot.lane.b32.xlu2 %v223_v38, %s540_s14  ;;  %v226_v50 = vrot.slane %v213_v41, 4  ;;  %v249_v21 = vsel %vm122_vm0, %v79_v16, %v248_v39  ;;  %v627_v53 = vsel %vm122_vm0, %v218_v37, %v177_v59  ;;  %v306_v60 = vrot.slane %v277_v43, 4 }
  0xa1   :  { %v282_v44 = vrot.slane %v253_v36, 4  ;;  %v231_v56 = vsel %vm122_vm0, %v230_v40, %v193_v49  ;;  %v318_v63 = vrot.slane %v281_v48, 4  ;;  %v257_v59 = vperm.slane %v249_v21, %v573_v26 }
  0xa2   :  { %v227_v57 = vsel %vm122_vm0, %v226_v50, %v189_v46  ;;  %v229_v22 = vsel %vm122_vm0, %v213_v41, %v228_v62  ;;  %v237_v8 = vsel %vm122_vm0, %v567_v20, %v236_v58  ;;  %v232_v9 = vrot.slane %v193_v49, 4 }
  0xa3   :  { %v89_v51 = vpop.permute.xlu0 %88  ;;  %v283_v52 = vsel %vm122_vm0, %v282_v44, %v241_v42  ;;  %v284_v11 = vrot.slane %v241_v42, 4  ;;  %v294_v12 = vrot.slane %v257_v59, 4  ;;  %v245_v18 = vperm.slane %v237_v8, %v573_v26 }
  0xa4   :  { %v259_v54 = vsel %vm122_vm0, %v258_v47, %v89_v51  ;;  %v260_v55 = vrot.slane %v89_v51, 4  ;;  %v289_v1 = vperm.slane %v283_v52, %v580_v45  ;;  %v233_v14 = vsel %vm122_vm0, %v217_v32, %v232_v9 }
  0xa5   :  { %v265_v61 = vperm.slane %v259_v54, %v573_v26  ;;  %367 = vrot.lane.b32.xlu0 %v231_v56, %s541_s15  ;;  %359 = vrot.lane.b32.xlu1 %v227_v57, %s542_s16  ;;  %v285_v20 = vsel %vm122_vm0, %v253_v36, %v284_v11  ;;  %v295_v23 = vsel %vm122_vm0, %v294_v12, %v245_v18  ;;  %v296_v28 = vrot.slane %v245_v18, 4 }
  0xa6   :  { %v261_v0 = vsel %vm122_vm0, %v109_v34, %v260_v55  ;;  %v332_v10 = vrot.slane %v289_v1, 4  ;;  %v293_v29 = vperm.slane %v285_v20, %v580_v45 }
  0xa7   :  { %v269_v2 = vperm.slane %v261_v0, %v573_v26  ;;  %v308_v3 = vrot.slane %v265_v61, 4  ;;  %v307_v4 = vsel %vm122_vm0, %v306_v60, %v265_v61  ;;  %v301_v26 = vperm.slane %v295_v23, %v580_v45 }
  0xa8   :  { %363 = vrot.lane.b32.xlu2 %v229_v22, %s543_s17  ;;  %v313_v5 = vperm.slane %v307_v4, %v580_v45  ;;  %v297_v30 = vsel %vm122_vm0, %v257_v59, %v296_v28  ;;  %v336_v34 = vrot.slane %v293_v29, 4 }
  0xa9   :  { %v309_v6 = vsel %vm122_vm0, %v277_v43, %v308_v3  ;;  %v319_v7 = vsel %vm122_vm0, %v318_v63, %v269_v2  ;;  %v320_v24 = vrot.slane %v269_v2, 4  ;;  %v305_v35 = vperm.slane %v297_v30, %v580_v45 }
  0xaa   :  { %v330_v13 = vrot.slane %v313_v5, 4  ;;  %v333_v15 = vsel %vm122_vm0, %v313_v5, %v332_v10  ;;  %v317_v16 = vperm.slane %v309_v6, %v580_v45  ;;  %v325_v17 = vperm.slane %v319_v7, %v580_v45 }
  0xab   :  { %v321_v33 = vsel %vm122_vm0, %v281_v48, %v320_v24  ;;  %v340_v38 = vrot.slane %v301_v26, 4  ;;  %v344_v39 = vrot.slane %v305_v35, 4 }
  0xac   :  { %v331_v19 = vsel %vm122_vm0, %v330_v13, %v289_v1  ;;  %v334_v25 = vrot.slane %v317_v16, 4  ;;  %v338_v27 = vrot.slane %v325_v17, 4  ;;  %v337_v36 = vsel %vm122_vm0, %v317_v16, %v336_v34 }
  0xad   :  { %371 = vrot.lane.b32.xlu1 %v233_v14, %s544_s18  ;;  %379 = vrot.lane.b32.xlu0 %v333_v15, %s545_s19  ;;  %v329_v37 = vperm.slane %v321_v33, %v580_v45  ;;  %v341_v41 = vsel %vm122_vm0, %v325_v17, %v340_v38 }
  0xae   :  { %v335_v31 = vsel %vm122_vm0, %v334_v25, %v293_v29  ;;  %v339_v32 = vsel %vm122_vm0, %v338_v27, %v301_v26 }
  0xaf   :  { %v342_v40 = vrot.slane %v329_v37, 4  ;;  %v345_v42 = vsel %vm122_vm0, %v329_v37, %v344_v39 }
  0xb0   :  { %375 = vrot.lane.b32.xlu2 %v331_v19, %s546_s20 }
  0xb1   :  { %v343_v43 = vsel %vm122_vm0, %v342_v40, %v305_v35  ;;  %vm436_vm0 = vcmask 654336  }
  0xb5   :  { %383 = vrot.lane.b32.xlu1 %v335_v31, %s547_s21  ;;  %391 = vrot.lane.b32.xlu0 %v339_v32, %s548_s22 }
  0xb8   :  { %387 = vrot.lane.b32.xlu2 %v337_v36, %s549_s23 }
  0xbd   :  { %395 = vrot.lane.b32.xlu1 %v341_v41, %s550_s24  ;;  %403 = vrot.lane.b32.xlu0 %v345_v42, %s551_s25 }
  0xc0   :  { %399 = vrot.lane.b32.xlu2 %v343_v43, %s552_s26 }
  0xfa   :  { %v352_v44 = vpop.permute.xlu2 %351 }
 0x102   :  { %v364_v47 = vpop.permute.xlu2 %363 }
 0x10a   :  { %v376_v54 = vpop.permute.xlu2 %375 }
 0x10f   :  { %v348_v46 = vpop.permute.xlu1 %347  ;;  %v356_v45 = vpop.permute.xlu0 %355 }
 0x110   :  { %v407_v48 = vsel %vm406_vm1, %v627_v53, %v348_v46 }
 0x111   :  { %v409_v49 = vsel %vm408_vm2, %v407_v48, %v352_v44 }
 0x112   :  { %v411_v51 = vsel %vm410_vm3, %v409_v49, %v356_v45  ;;  %v388_v53 = vpop.permute.xlu2 %387 }
 0x117   :  { %v360_v50 = vpop.permute.xlu1 %359  ;;  %v368_v21 = vpop.permute.xlu0 %367 }
 0x118   :  { %v413_v52 = vsel %vm412_vm4, %v411_v51, %v360_v50 }
 0x119   :  { %v415_v55 = vsel %vm414_vm5, %v413_v52, %v364_v47 }
 0x11a   :  { %v417_v58 = vsel %vm416_vm6, %v415_v55, %v368_v21  ;;  %v400_v22 = vpop.permute.xlu2 %399 }
 0x11f   :  { %v372_v56 = vpop.permute.xlu1 %371  ;;  %v380_v57 = vpop.permute.xlu0 %379 }
 0x120   :  { %v419_v60 = vsel %vm418_vm7, %v417_v58, %v372_v56 }
 0x121   :  { %v421_v61 = vsel %vm420_vm8, %v419_v60, %v376_v54 }
 0x122   :  { %v423_v59 = vsel %vm422_vm9, %v421_v61, %v380_v57 }
 0x127   :  { %v384_v62 = vpop.permute.xlu1 %383  ;;  %v392_v63 = vpop.permute.xlu0 %391 }
 0x128   :  { %v425_v0 = vsel %vm424_vm10, %v423_v59, %v384_v62 }
 0x129   :  { %v427_v1 = vsel %vm426_vm11, %v425_v0, %v388_v53 }
 0x12a   :  { %v429_v2 = vsel %vm428_vm12, %v427_v1, %v392_v63 }
 0x12f   :  { %v396_v3 = vpop.permute.xlu1 %395  ;;  %v404_v6 = vpop.permute.xlu0 %403 }
 0x130   :  { %v431_v4 = vsel %vm430_vm13, %v429_v2, %v396_v3 }
 0x131   :  { %v433_v5 = vsel %vm432_vm14, %v431_v4, %v400_v22 }
 0x132   :  { %v435_v7 = vsel %vm434_vm15, %v433_v5, %v404_v6 }
 0x133   :  { %437 = vst.msk [vmem:[#allocation5] sm:$0xff] %vm436_vm0, %v435_v7 }
 0x134   :  { %448 = dma.vmem_to_hbm [thread:$0]  %s444_s28, 128, %s446_s2, [#allocation4]  }
 0x135   :  { %530 = dma.done.wait [#allocation4], 128  }
 0x136   :  { %531 = vsyncadd [#allocation4], 4294967168 }
 0x137   :  { %453 = vsyncpa [#allocation3], 1 }
 0x138   :  { %454 = vsyncpa [#allocation4], 1 }

// kernel: tpu_custom_call.1
= control target key start
LH: loop header
LB: loop body
LE: loop exit
PB: predicated region body
PF: predicated region fallthrough
CT: control target
= control target key end

     0   :  { %6 = vsyncpa [#allocation3], 0  ;;  %s511_s0 = inlined_call_operand.hbm [shape: f32[8,16,16], index: 0, kind: input, shape index: {}]   ;;  %s512_s1 = inlined_call_operand.vmem [shape: f32[8,16,5], index: 1, kind: output, shape index: {}]  }
   0x1   :  { %8 = vsyncpa [#allocation3 + $0x1], 0  ;;  %s412_s6 = smov 0   ;;  %s414_s7 = smov 0  }
   0x2   :  { %s416_s8 = smov 0   ;;  %s418_s9 = smov 0  }
   0x3 LB: > { %s270_s10 = sadd.s32 4294967295, %s397_s9   ;;  %s432_s11 = sadd.s32 1, %s397_s9   ;;  %s397_s9 = sphi %s418_s9, %s519_s9   ;;  %s393_s8 = sphi %s416_s8, %s518_s8   ;;  %s389_s7 = sphi %s414_s7, %s517_s7   ;;  %s385_s6 = sphi %s412_s6, %s516_s6  }
   0x4   : > { %s18_s12 = ssub.s32 %s397_s9, %s432_s11  ;;  %s21_s13 = sadd.s32 1, %s393_s8 }
   0x5   : > { %p19_p0 = scmp.eq.s32.totalorder %s18_s12, 0  ;;  %p28_p1 = scmp.ne.s32.totalorder %s393_s8, %s389_s7 }
   0x6   : > { %p29_p2 = scmp.eq.s32.totalorder %s397_s9, 0  ;;  %p34_p3 = scmp.ne.s32.totalorder %s389_s7, %s385_s6 }
   0x7   : > { %s442_s14 = scalar_select %p19_p0, %s393_s8, %s21_s13  }
   0x8   : > { %p444_p4 = por %p29_p2, %p28_p1  ;;  %p35_p5 = scmp.eq.s32.totalorder %s270_s10, 0 }
   0x9   : > { %p294_p6 = scmp.lt.s32.totalorder %s397_s9, 2  ;;  %s84_s17 = sand.u32 1, %s393_s8  }
   0xa   : > { %p451_p7 = por %p35_p5, %p34_p3  ;;  %s274_s18 = sshll.u32 %s84_s17, 6 }
   0xb   : > { %s286_s19 = sshll.u32 %s397_s9, 6  ;;  %s88_s23 = scalar_lea.vmem [#allocation2], %s274_s18 }
   0xc   : > { %s94_s22 = scalar_lea.hbm %s511_s0, %s286_s19  ;;  %s97_s24 = sshll.u32 %s88_s23, 4  ;;  %s98_s24 = int_to_ptr.vmem [resolvable:$true] %s97_s24 }
   0xd   : > { %s95_s25 = sshll.u32 %s94_s22, 4  ;;  %p462_p8 = pnand %p294_p6, %p444_p4  ;;  %s96_s25 = int_to_ptr.hbm [resolvable:$true] %s95_s25 }
   0xe   : > { %p278_p9 = scmp.ge.s32.totalorder %s397_s9, 1  ;;  %s85_s27 = scalar_lea.sflag [#allocation3], %s84_s17 }
   0xf   : > { %s333_s28 = sshra.s32 %s96_s25, 4  ;;  %p337_p11 = pneg %p462_p8  ;;  %s334_s28 = int_to_ptr.hbm [resolvable:$true] %s333_s28 }
  0x10   : > { %s335_s29 = scalar_lea.hbm %s334_s28, 64  ;;  %s340_s3 = scalar_lea.hbm %s511_s0, 128 }
  0x11   : > { %p336_p10 = scmp.ne.s32.totalorder %s334_s28, %s335_s29  ;;  %p341_p0 = scmp.lt.s32.totalorder %s334_s28, %s511_s0 }
  0x12   : > { %p342_p1 = scmp.lt.s32.totalorder %s340_s3, %s335_s29 }
  0x13   : > { %p338_p12 = pnand %p337_p11, %p336_p10 }
  0x14   : > { %p343_p2 = por %p342_p1, %p341_p0 }
  0x15   : > { %p339_p13 = pneg %p338_p12 }
  0x17   : > { %p344_p3 = pnand %p343_p2, %p339_p13 }
  0x19   : > { %347 = shalt.err (!%p344_p3)
}
  0x1a   : > { %s399_s6 = smov 128   ;;  %s400_s12 = smov 8  }
  0x1b   : > { %293 = dma.hbm_to_vmem [thread:$0]  (!%p462_p8), %s96_s25, 1024, %s98_s24, %s85_s27, %s399_s6, %s399_s6, %s400_s12  }
  0x1c   : > { %p105_p4 = scmp.lt.s32.totalorder %s397_s9, 3 }
  0x1e   : > { %p106_p5 = pnand %p278_p9, %p105_p4 }
  0x1f   : > { %s111_s13 = sand.u32 (!%p106_p5), 1, %s389_s7  }
  0x20   : > { %109 = sbr.rel (%p106_p5) target bundleno = 173 (0xad), region = 24  ;;  %s279_s15 = sshll.u32 (!%p106_p5), %s111_s13, 6 }
  0x21   : > { %s112_s17 = scalar_lea.sflag (!%p106_p5), [#allocation3], %s111_s13  ;;  %s115_s18 = scalar_lea.vmem (!%p106_p5), [#allocation2], %s279_s15 }
  0x25   : > { %380 = dma.done.wait (%p451_p7), %s112_s17, 1024  }
  0x26   : > { %382 = vsyncadd (%p451_p7), %s112_s17, 4294966272  ;;  %v401_v0 = vmov 0   ;;  %v146_v1 = vld [vmem:[%s115_s18 + $0x10] sm:$0xff]  ;;  %v144_v2 = vld [vmem:[%s115_s18] sm:$0xff]  ;;  %s280_s16 = sshll.u32 %s270_s10, 2  ;;  %vm192_vm0 = vcmask 39936  }
  0x27   : > { %331 = vset.pattern.permute.xlu1 %v401_v0  ;;  %330 = vset.pattern.permute.xlu0 %v401_v0  ;;  %v148_v3 = vld [vmem:[%s115_s18 + $0x20] sm:$0xff]  ;;  %v147_v4 = vld [vmem:[%s115_s18 + $0x18] sm:$0xff]  ;;  %v145_v5 = vld [vmem:[%s115_s18 + $0x8] sm:$0xff]  ;;  %p138_p6 = scmp.lt.s32.totalorder %s280_s16, 7 }
  0x28   : > { %332 = vset.pattern.permute.xlu2 %v401_v0  ;;  %164 = vperm.xlu1 %331, %v146_v1   ;;  %v149_v6 = vld [vmem:[%s115_s18 + $0x28] sm:$0xff]  ;;  %v151_v7 = vld [vmem:[%s115_s18 + $0x38] sm:$0xff]  ;;  %v150_v8 = vld [vmem:[%s115_s18 + $0x30] sm:$0xff] }
  0x29   : > { %154 = vperm.xlu0 %330, %v144_v2   ;;  %174 = vperm.xlu2 %332, %v148_v3   ;;  %s521_s16 = smov (!%p138_p6, %s280_s16), 7 }
  0x2a   : > { %s287_s19 = sshll.u32 %s521_s16, 4 }
  0x2b   : > { %s142_s22 = scalar_lea.vmem %s512_s1, %s287_s19 }
  0x30   : > { %169 = vperm.xlu1 %331, %v147_v4  }
  0x31   : > { %159 = vperm.xlu0 %330, %v145_v5   ;;  %179 = vperm.xlu2 %332, %v149_v6  }
  0x38   : > { %189 = vperm.xlu1 %331, %v151_v7  }
  0x39   : > { %184 = vperm.xlu0 %330, %v150_v8  }
  0x83   : > { %v175_v9 = vpop.permute.xlu2 %174 }
  0x84   : > { %197 = vst.msk [vmem:[%s142_s22 + $0x20] sm:$0xff] %vm192_vm0, %v175_v9 }
  0x8b   : > { %v180_v14 = vpop.permute.xlu2 %179 }
  0x8c   : > { %198 = vst.msk [vmem:[%s142_s22 + $0x28] sm:$0xff] %vm192_vm0, %v180_v14 }
  0x9a   : > { %v165_v10 = vpop.permute.xlu1 %164 }
  0x9b   : > { %v155_v11 = vpop.permute.xlu0 %154  ;;  %195 = vst.msk [vmem:[%s142_s22 + $0x10] sm:$0xff] %vm192_vm0, %v165_v10 }
  0x9c   : > { %193 = vst.msk [vmem:[%s142_s22] sm:$0xff] %vm192_vm0, %v155_v11 }
  0xa2   : > { %v170_v12 = vpop.permute.xlu1 %169 }
  0xa3   : > { %v160_v13 = vpop.permute.xlu0 %159  ;;  %196 = vst.msk [vmem:[%s142_s22 + $0x18] sm:$0xff] %vm192_vm0, %v170_v12 }
  0xa4   : > { %194 = vst.msk [vmem:[%s142_s22 + $0x8] sm:$0xff] %vm192_vm0, %v160_v13 }
  0xaa   : > { %v190_v15 = vpop.permute.xlu1 %189 }
  0xab   : > { %v185_v16 = vpop.permute.xlu0 %184  ;;  %200 = vst.msk [vmem:[%s142_s22 + $0x38] sm:$0xff] %vm192_vm0, %v190_v15 }
  0xac   : > { %199 = vst.msk [vmem:[%s142_s22 + $0x30] sm:$0xff] %vm192_vm0, %v185_v16 }
  0xad PF: > { %p11_p7 = scmp.ge.s32.totalorder %s432_s11, 4   ;;  %s516_s6 = smov %s389_s7 }
  0xae   : > { %s517_s7 = smov %s393_s8  ;;  %s518_s8 = smov %s442_s14 }
  0xaf   : > { %s519_s9 = smov %s432_s11  ;;  %13 = sbr.rel (!%p11_p7) target bundleno = 3 (0x3), region = 64 }
  0xb4   :  { %225 = vsyncpa [#allocation3], 1 }
  0xb5   :  { %227 = vsyncpa [#allocation3 + $0x1], 1 }

</bundles_post_ra>
